<compile_context>
chip_gen: v7x
topology: tpu7x:2x2x1
jax: 0.10.0
libtpu: 0.0.40
codegen_flags: <defaults>
</compile_context>

<pallas_src>
import functools
from typing import NamedTuple, Tuple

import jax
import jax.numpy as jnp
from jax import lax
from jax.experimental import pallas as pl
from jax.experimental.pallas import tpu as pltpu


def _round_up(x, m):
    return ((x + m - 1) // m) * m


class QNetMeta(NamedTuple):
    H: int
    A: int
    F: int
    F_pad: int
    HC: int
    D2p: int
    L: int
    Lp: int
    off_lstm: Tuple[int, int, int]
    off_mlp: Tuple[int, int, int, int, int, int]


# --------------------------------------------------------------------------- #
# Kernel
# --------------------------------------------------------------------------- #
def _qnetwork_kernel(s_ref, x2_ref, lstm_w_ref, mlp_w_ref, q_ref, *, T, meta):
    """
    s_ref      : (T*B, F_pad)   time-major, flattened observations (zero padded)
    x2_ref     : (B, D2p)       [feat | action | zero pad]
    lstm_w_ref : (rows, 4H)     packed: w_ih.T | w_hh.T | (b_ih + b_hh)
    mlp_w_ref  : (rows, Lp)     packed: w1h.T | w1fa.T | w2.T | w3.T | wq.T | b1..bq
    q_ref      : (B, Lp)        lane-dense output slab; cols >= A are zero
    """
    TB, F_pad = s_ref.shape
    B = TB // T
    H = meta.H
    H4 = 4 * H
    Lp = meta.Lp
    D2p = x2_ref.shape[1]

    o_wih, o_whh, o_bl = meta.off_lstm
    o_w1h, o_w1fa, o_w2, o_w3, o_wq, o_bias = meta.off_mlp

    # ---------------- LSTM (single layer, unidirectional) ----------------
    lstm_w = lstm_w_ref[...]
    w_ih_t = lstm_w[o_wih:o_wih + F_pad, :]          # (F_pad, 4H), pre-transposed
    w_hh_t = lstm_w[o_whh:o_whh + H, :]              # (H,    4H), pre-transposed
    b_lstm = lstm_w[o_bl:o_bl + 1, :]                # (1, 4H) = b_ih + b_hh

    # Batched input projection for all timesteps (already flattened in wrapper).
    x_proj = jnp.dot(s_ref[...], w_ih_t,
                     preferred_element_type=jnp.float32) + b_lstm   # (T*B, 4H)

    # Gate lane masks hoisted out of the loop:
    #   g (cell candidate) lanes use plain tanh; i/f/o lanes use sigmoid via
    #   the tanh identity sigmoid(x) = 0.5 * (1 + tanh(0.5 * x)).
    lane = lax.broadcasted_iota(jnp.int32, (B, H4), 1)
    g_lane = (lane >= 2 * H) & (lane < 3 * H)
    gate_mult = jnp.where(g_lane, 1.0, 0.5).astype(jnp.float32)     # pre-scale
    gate_off = jnp.where(g_lane, 0.0, 0.5).astype(jnp.float32)      # fix-up offset

    h = jnp.zeros((B, H), jnp.float32)
    c = jnp.zeros((B, H), jnp.float32)
    # TODO(synk): latch w_hh_t in the MXU across the unrolled recurrence with
    # pltpu.matmul_push_rhs / matmul_acc_lhs / matmul_pop once validated against
    # the bundle dump; for now rely on Mosaic to hoist the redundant RHS pushes.
    for t in range(T):                               # static unroll (T small & fixed)
        g = x_proj[t * B:(t + 1) * B, :] + jnp.dot(
            h, w_hh_t, preferred_element_type=jnp.float32)          # (B, 4H)
        y = jnp.tanh(g * gate_mult)                  # single EUP pass per step
        act = gate_off + gate_mult * y               # VPU fma: sigmoid/tanh select
        i_g = act[:, 0 * H:1 * H]
        f_g = act[:, 1 * H:2 * H]
        g_g = act[:, 2 * H:3 * H]
        o_g = act[:, 3 * H:4 * H]
        c = f_g * c + i_g * g_g
        h = o_g * jnp.tanh(c)

    # ---------------- QvalModel MLP on [h | feat | action] ----------------
    mlp = mlp_w_ref[...]
    w1h_t = mlp[o_w1h:o_w1h + H, :]                  # (H,   Lp)
    w1fa_t = mlp[o_w1fa:o_w1fa + D2p, :]             # (D2p, Lp) (zero pad rows)
    w2_t = mlp[o_w2:o_w2 + Lp, :]                    # (Lp, Lp)  (zero pad rows/cols)
    w3_t = mlp[o_w3:o_w3 + Lp, :]                    # (Lp, Lp)
    wq_t = mlp[o_wq:o_wq + Lp, :]                    # (Lp, Lp)  (cols >= A zero)
    b1 = mlp[o_bias + 0:o_bias + 1, :]
    b2 = mlp[o_bias + 1:o_bias + 2, :]
    b3 = mlp[o_bias + 2:o_bias + 3, :]
    bq = mlp[o_bias + 3:o_bias + 4, :]

    x2 = x2_ref[...]                                 # (B, D2p)
    z1 = (jnp.dot(h, w1h_t, preferred_element_type=jnp.float32)
          + jnp.dot(x2, w1fa_t, preferred_element_type=jnp.float32) + b1)
    a1 = jnp.maximum(z1, 0.0)
    a2 = jnp.maximum(jnp.dot(a1, w2_t, preferred_element_type=jnp.float32) + b2, 0.0)
    a3 = jnp.maximum(jnp.dot(a2, w3_t, preferred_element_type=jnp.float32) + b3, 0.0)
    # Lane-dense store of the full (B, Lp) slab; wrapper slices [:, :A].
    q_ref[...] = (jnp.dot(a3, wq_t, preferred_element_type=jnp.float32)
                  + bq).astype(q_ref.dtype)


# --------------------------------------------------------------------------- #
# One-time weight packing (out of the per-call forward path)
# --------------------------------------------------------------------------- #
def pack_qnetwork_params(params, n_features, n_handcrafted, n_action):
    """Pre-transpose and pack all weights into two tile-aligned f32 slabs."""
    H = params["w_hh"].shape[1]
    F = n_features
    HC = n_handcrafted
    A = n_action
    L = params["w2"].shape[0]                        # last_hidden

    F_pad = _round_up(F, 8)
    D2 = HC + A
    D2p = _round_up(D2, 8)
    Lp = _round_up(L, 128)                           # full lane tile for the MLP
    H4 = 4 * H

    # ---- LSTM pack: w_ih.T | w_hh.T | (b_ih + b_hh), 8-row-aligned segments ----
    o_wih = 0
    o_whh = F_pad
    o_bl = F_pad + _round_up(H, 8)
    lstm_rows = _round_up(o_bl + 1, 8)
    lstm_w = jnp.zeros((lstm_rows, H4), jnp.float32)
    lstm_w = lstm_w.at[o_wih:o_wih + F, :].set(params["w_ih"].T.astype(jnp.float32))
    lstm_w = lstm_w.at[o_whh:o_whh + H, :].set(params["w_hh"].T.astype(jnp.float32))
    lstm_w = lstm_w.at[o_bl, :].set((params["b_ih"] + params["b_hh"]).astype(jnp.float32))

    # ---- MLP pack: all (in, out)-oriented, zero-padded to Lp lanes ----
    Hp = _round_up(H, 8)
    o_w1h = 0
    o_w1fa = Hp
    o_w2 = o_w1fa + D2p
    o_w3 = o_w2 + Lp
    o_wq = o_w3 + Lp
    o_bias = o_wq + Lp
    mlp_rows = _round_up(o_bias + 4, 8)

    w1_t = params["w1"].T.astype(jnp.float32)        # (H + HC + A, L): [h | feat | action]
    mlp_w = jnp.zeros((mlp_rows, Lp), jnp.float32)
    mlp_w = mlp_w.at[o_w1h:o_w1h + H, :L].set(w1_t[:H])
    mlp_w = mlp_w.at[o_w1fa:o_w1fa + D2, :L].set(w1_t[H:])
    mlp_w = mlp_w.at[o_w2:o_w2 + L, :L].set(params["w2"].T.astype(jnp.float32))
    mlp_w = mlp_w.at[o_w3:o_w3 + L, :L].set(params["w3"].T.astype(jnp.float32))
    mlp_w = mlp_w.at[o_wq:o_wq + L, :A].set(params["wq"].T.astype(jnp.float32))
    mlp_w = mlp_w.at[o_bias + 0, :L].set(params["b1"].astype(jnp.float32))
    mlp_w = mlp_w.at[o_bias + 1, :L].set(params["b2"].astype(jnp.float32))
    mlp_w = mlp_w.at[o_bias + 2, :L].set(params["b3"].astype(jnp.float32))
    mlp_w = mlp_w.at[o_bias + 3, :A].set(params["bq"].astype(jnp.float32))

    meta = QNetMeta(H=H, A=A, F=F, F_pad=F_pad, HC=HC, D2p=D2p, L=L, Lp=Lp,
                    off_lstm=(o_wih, o_whh, o_bl),
                    off_mlp=(o_w1h, o_w1fa, o_w2, o_w3, o_wq, o_bias))
    return lstm_w, mlp_w, meta


# --------------------------------------------------------------------------- #
# Forward (jitted; only tiny activation padding happens per call)
# --------------------------------------------------------------------------- #
def _qnetwork_forward_impl(s, feat, action, lstm_w, mlp_w, meta):
    """mode='batch': s (B,T,F), feat (B,1,HC) or (B,HC), action (B,A)."""
    if feat.ndim == 3:
        feat = feat[:, 0, :]                         # feat.squeeze(1)
    B, T, F = s.shape
    H, A, HC = meta.H, meta.A, meta.HC
    F_pad, D2p, Lp = meta.F_pad, meta.D2p, meta.Lp

    B_pad = _round_up(max(B, 1), 8)                  # f32 sublane alignment

    # Time-major, flattened, zero-padded observations: (T*B_pad, F_pad).
    s_p = jnp.zeros((B_pad, T, F_pad), jnp.float32).at[:B, :, :F].set(
        s.astype(jnp.float32))
    s_tm = jnp.transpose(s_p, (1, 0, 2)).reshape(T * B_pad, F_pad)

    # [feat | action] padded to D2p lanes.
    x2 = jnp.zeros((B_pad, D2p), jnp.float32)
    x2 = x2.at[:B, :HC].set(feat.astype(jnp.float32))
    x2 = x2.at[:B, HC:HC + A].set(action.astype(jnp.float32))

    kernel = functools.partial(_qnetwork_kernel, T=T, meta=meta)
    vmem = pl.BlockSpec(memory_space=pltpu.MemorySpace.VMEM)
    q_slab = pl.pallas_call(
        kernel,
        out_shape=jax.ShapeDtypeStruct((B_pad, Lp), jnp.float32),
        in_specs=[vmem, vmem, vmem, vmem],
        out_specs=vmem,
    )(s_tm, x2, lstm_w, mlp_w)
    # TODO(synk): for large batches (twin critics / replay batch), add a batch
    # grid axis with dimension_semantics=("parallel",) to use v7x's second core.
    return q_slab[:B, :A]


qnetwork_forward = jax.jit(_qnetwork_forward_impl, static_argnames=("meta",))


# --------------------------------------------------------------------------- #
# Parameter init + pure-JAX reference (verification only)
# --------------------------------------------------------------------------- #
def init_params(key, n_features, n_hidden, n_handcrafted, n_action):
    feat_dim = n_hidden + n_handcrafted              # n_layers = directions = 1, use_handcraft = 1
    last_hidden = 2 * feat_dim
    ks = jax.random.split(key, 12)
    scale = 0.1
    return {
        "w_ih": jax.random.normal(ks[0], (4 * n_hidden, n_features), jnp.float32) * scale,
        "w_hh": jax.random.normal(ks[1], (4 * n_hidden, n_hidden), jnp.float32) * scale,
        "b_ih": jax.random.normal(ks[2], (4 * n_hidden,), jnp.float32) * scale,
        "b_hh": jax.random.normal(ks[3], (4 * n_hidden,), jnp.float32) * scale,
        "w1": jax.random.normal(ks[4], (last_hidden, feat_dim + n_action), jnp.float32) * scale,
        "b1": jax.random.normal(ks[5], (last_hidden,), jnp.float32) * scale,
        "w2": jax.random.normal(ks[6], (last_hidden, last_hidden), jnp.float32) * scale,
        "b2": jax.random.normal(ks[7], (last_hidden,), jnp.float32) * scale,
        "w3": jax.random.normal(ks[8], (last_hidden, last_hidden), jnp.float32) * scale,
        "b3": jax.random.normal(ks[9], (last_hidden,), jnp.float32) * scale,
        "wq": jax.random.normal(ks[10], (n_action, last_hidden), jnp.float32) * scale,
        "bq": jax.random.normal(ks[11], (n_action,), jnp.float32) * scale,
    }


def _reference_forward(s, feat, action, params):
    if feat.ndim == 3:
        feat = feat[:, 0, :]
    B, T, F = s.shape
    H = params["w_hh"].shape[1]
    b = (params["b_ih"] + params["b_hh"])[None, :]
    h = jnp.zeros((B, H), jnp.float32)
    c = jnp.zeros((B, H), jnp.float32)
    for t in range(T):
        g = s[:, t, :] @ params["w_ih"].T + h @ params["w_hh"].T + b
        i = jax.nn.sigmoid(g[:, :H]); f = jax.nn.sigmoid(g[:, H:2 * H])
        gg = jnp.tanh(g[:, 2 * H:3 * H]); o = jax.nn.sigmoid(g[:, 3 * H:])
        c = f * c + i * gg
        h = o * jnp.tanh(c)
    x = jnp.concatenate([h, feat, action], axis=1)
    a1 = jax.nn.relu(x @ params["w1"].T + params["b1"])
    a2 = jax.nn.relu(a1 @ params["w2"].T + params["b2"])
    a3 = jax.nn.relu(a2 @ params["w3"].T + params["b3"])
    return a3 @ params["wq"].T + params["bq"]


if __name__ == "__main__":
    # args: n_features=3, n_hidden=16, n_rnn_layers=1, bidirectional=False,
    #       rnn_directions=1, n_handcrafted_features=5, use_handcraft=1, n_action=2
    B, T = 2, 8
    n_features, n_hidden, n_handcrafted, n_action = 3, 16, 5, 2

    key = jax.random.PRNGKey(0)
    k_s, k_f, k_a, k_p = jax.random.split(key, 4)
    s = jax.random.normal(k_s, (B, T, n_features), jnp.float32)
    feat = jax.random.normal(k_f, (B, 1, n_handcrafted), jnp.float32)
    action = jax.random.normal(k_a, (B, n_action), jnp.float32)
    params = init_params(k_p, n_features, n_hidden, n_handcrafted, n_action)

    # Pack weights ONCE (outside the per-call forward path).
    lstm_w, mlp_w, meta = pack_qnetwork_params(params, n_features, n_handcrafted, n_action)
    lstm_w, mlp_w = jax.block_until_ready((lstm_w, mlp_w))

    q = qnetwork_forward(s, feat, action, lstm_w, mlp_w, meta)
    q = jax.block_until_ready(q)

    q_ref = _reference_forward(s, feat, action, params)
    assert q.shape == (B, n_action)
    assert jnp.max(jnp.abs(q - q_ref)) < 1e-4, "mismatch vs reference"
    print("KERNEL_OK")
</pallas_src>

<mosaic_0001>
module attributes {stable_mosaic.version = 11 : i64} {
  func.func @_qnetwork_kernel(%arg0: memref<64x8xf32, #tpu.memory_space<vmem>>, %arg1: memref<8x8xf32, #tpu.memory_space<vmem>>, %arg2: memref<32x64xf32, #tpu.memory_space<vmem>>, %arg3: memref<416x128xf32, #tpu.memory_space<vmem>>, %arg4: memref<8x128xf32, #tpu.memory_space<vmem>>) attributes {dimension_semantics = [], scalar_prefetch = 0 : i64, scratch_operands = 0 : i64, tpu.core_type = #tpu.core_type<tc>} {
    %c0 = arith.constant 0 : index
    %c0_0 = arith.constant 0 : index
    %0 = vector.load %arg2[%c0, %c0_0] : memref<32x64xf32, #tpu.memory_space<vmem>>, vector<32x64xf32>
    %1 = vector.extract_strided_slice %0 {offsets = [0, 0], sizes = [8, 64], strides = [1, 1]} : vector<32x64xf32> to vector<8x64xf32>
    %2 = vector.extract_strided_slice %0 {offsets = [8, 0], sizes = [16, 64], strides = [1, 1]} : vector<32x64xf32> to vector<16x64xf32>
    %3 = vector.extract_strided_slice %0 {offsets = [24, 0], sizes = [1, 64], strides = [1, 1]} : vector<32x64xf32> to vector<1x64xf32>
    %c0_1 = arith.constant 0 : index
    %c0_2 = arith.constant 0 : index
    %4 = vector.load %arg0[%c0_1, %c0_2] : memref<64x8xf32, #tpu.memory_space<vmem>>, vector<64x8xf32>
    %cst = arith.constant dense<0.000000e+00> : vector<64x64xf32>
    %5 = tpu.matmul %4, %1, %cst {dimension_numbers = #tpu.dot_dimension_numbers<[1], [0], [0], [1], [0, 0, 1, 1], [], []>} : vector<64x8xf32>, vector<8x64xf32>, vector<64x64xf32> -> vector<64x64xf32>
    %6 = vector.broadcast %3 : vector<1x64xf32> to vector<64x64xf32>
    %7 = arith.addf %5, %6 : vector<64x64xf32>
    %8 = tpu.iota {dimensions = array<i32: 1>} : vector<8x64xi32>
    %c32_i32 = arith.constant 32 : i32
    %9 = vector.broadcast %c32_i32 : i32 to vector<8x64xi32>
    %10 = arith.cmpi sge, %8, %9 : vector<8x64xi32>
    %c48_i32 = arith.constant 48 : i32
    %11 = vector.broadcast %c48_i32 : i32 to vector<8x64xi32>
    %12 = arith.cmpi slt, %8, %11 : vector<8x64xi32>
    %13 = arith.andi %10, %12 : vector<8x64xi1>
    %cst_3 = arith.constant 1.000000e+00 : f32
    %cst_4 = arith.constant 5.000000e-01 : f32
    %14 = vector.broadcast %cst_3 : f32 to vector<8x64xf32>
    %15 = vector.broadcast %cst_4 : f32 to vector<8x64xf32>
    %16 = arith.select %13, %14, %15 : vector<8x64xi1>, vector<8x64xf32>
    %cst_5 = arith.constant 0.000000e+00 : f32
    %cst_6 = arith.constant 5.000000e-01 : f32
    %17 = vector.broadcast %cst_5 : f32 to vector<8x64xf32>
    %18 = vector.broadcast %cst_6 : f32 to vector<8x64xf32>
    %19 = arith.select %13, %17, %18 : vector<8x64xi1>, vector<8x64xf32>
    %cst_7 = arith.constant 0.000000e+00 : f32
    %20 = vector.broadcast %cst_7 : f32 to vector<8x16xf32>
    %cst_8 = arith.constant 0.000000e+00 : f32
    %21 = vector.broadcast %cst_8 : f32 to vector<8x16xf32>
    %22 = vector.extract_strided_slice %7 {offsets = [0, 0], sizes = [8, 64], strides = [1, 1]} : vector<64x64xf32> to vector<8x64xf32>
    %cst_9 = arith.constant dense<0.000000e+00> : vector<8x64xf32>
    %23 = tpu.matmul %20, %2, %cst_9 {dimension_numbers = #tpu.dot_dimension_numbers<[1], [0], [0], [1], [0, 0, 1, 1], [], []>} : vector<8x16xf32>, vector<16x64xf32>, vector<8x64xf32> -> vector<8x64xf32>
    %24 = arith.addf %22, %23 : vector<8x64xf32>
    %25 = arith.mulf %24, %16 : vector<8x64xf32>
    %26 = math.tanh %25 : vector<8x64xf32>
    %27 = arith.mulf %16, %26 : vector<8x64xf32>
    %28 = arith.addf %19, %27 : vector<8x64xf32>
    %29 = vector.extract_strided_slice %28 {offsets = [0, 0], sizes = [8, 16], strides = [1, 1]} : vector<8x64xf32> to vector<8x16xf32>
    %30 = vector.extract_strided_slice %28 {offsets = [0, 16], sizes = [8, 16], strides = [1, 1]} : vector<8x64xf32> to vector<8x16xf32>
    %31 = vector.extract_strided_slice %28 {offsets = [0, 32], sizes = [8, 16], strides = [1, 1]} : vector<8x64xf32> to vector<8x16xf32>
    %32 = vector.extract_strided_slice %28 {offsets = [0, 48], sizes = [8, 16], strides = [1, 1]} : vector<8x64xf32> to vector<8x16xf32>
    %33 = arith.mulf %30, %21 : vector<8x16xf32>
    %34 = arith.mulf %29, %31 : vector<8x16xf32>
    %35 = arith.addf %33, %34 : vector<8x16xf32>
    %36 = math.tanh %35 : vector<8x16xf32>
    %37 = arith.mulf %32, %36 : vector<8x16xf32>
    %38 = vector.extract_strided_slice %7 {offsets = [8, 0], sizes = [8, 64], strides = [1, 1]} : vector<64x64xf32> to vector<8x64xf32>
    %cst_10 = arith.constant dense<0.000000e+00> : vector<8x64xf32>
    %39 = tpu.matmul %37, %2, %cst_10 {dimension_numbers = #tpu.dot_dimension_numbers<[1], [0], [0], [1], [0, 0, 1, 1], [], []>} : vector<8x16xf32>, vector<16x64xf32>, vector<8x64xf32> -> vector<8x64xf32>
    %40 = arith.addf %38, %39 : vector<8x64xf32>
    %41 = arith.mulf %40, %16 : vector<8x64xf32>
    %42 = math.tanh %41 : vector<8x64xf32>
    %43 = arith.mulf %16, %42 : vector<8x64xf32>
    %44 = arith.addf %19, %43 : vector<8x64xf32>
    %45 = vector.extract_strided_slice %44 {offsets = [0, 0], sizes = [8, 16], strides = [1, 1]} : vector<8x64xf32> to vector<8x16xf32>
    %46 = vector.extract_strided_slice %44 {offsets = [0, 16], sizes = [8, 16], strides = [1, 1]} : vector<8x64xf32> to vector<8x16xf32>
    %47 = vector.extract_strided_slice %44 {offsets = [0, 32], sizes = [8, 16], strides = [1, 1]} : vector<8x64xf32> to vector<8x16xf32>
    %48 = vector.extract_strided_slice %44 {offsets = [0, 48], sizes = [8, 16], strides = [1, 1]} : vector<8x64xf32> to vector<8x16xf32>
    %49 = arith.mulf %46, %35 : vector<8x16xf32>
    %50 = arith.mulf %45, %47 : vector<8x16xf32>
    %51 = arith.addf %49, %50 : vector<8x16xf32>
    %52 = math.tanh %51 : vector<8x16xf32>
    %53 = arith.mulf %48, %52 : vector<8x16xf32>
    %54 = vector.extract_strided_slice %7 {offsets = [16, 0], sizes = [8, 64], strides = [1, 1]} : vector<64x64xf32> to vector<8x64xf32>
    %cst_11 = arith.constant dense<0.000000e+00> : vector<8x64xf32>
    %55 = tpu.matmul %53, %2, %cst_11 {dimension_numbers = #tpu.dot_dimension_numbers<[1], [0], [0], [1], [0, 0, 1, 1], [], []>} : vector<8x16xf32>, vector<16x64xf32>, vector<8x64xf32> -> vector<8x64xf32>
    %56 = arith.addf %54, %55 : vector<8x64xf32>
    %57 = arith.mulf %56, %16 : vector<8x64xf32>
    %58 = math.tanh %57 : vector<8x64xf32>
    %59 = arith.mulf %16, %58 : vector<8x64xf32>
    %60 = arith.addf %19, %59 : vector<8x64xf32>
    %61 = vector.extract_strided_slice %60 {offsets = [0, 0], sizes = [8, 16], strides = [1, 1]} : vector<8x64xf32> to vector<8x16xf32>
    %62 = vector.extract_strided_slice %60 {offsets = [0, 16], sizes = [8, 16], strides = [1, 1]} : vector<8x64xf32> to vector<8x16xf32>
    %63 = vector.extract_strided_slice %60 {offsets = [0, 32], sizes = [8, 16], strides = [1, 1]} : vector<8x64xf32> to vector<8x16xf32>
    %64 = vector.extract_strided_slice %60 {offsets = [0, 48], sizes = [8, 16], strides = [1, 1]} : vector<8x64xf32> to vector<8x16xf32>
    %65 = arith.mulf %62, %51 : vector<8x16xf32>
    %66 = arith.mulf %61, %63 : vector<8x16xf32>
    %67 = arith.addf %65, %66 : vector<8x16xf32>
    %68 = math.tanh %67 : vector<8x16xf32>
    %69 = arith.mulf %64, %68 : vector<8x16xf32>
    %70 = vector.extract_strided_slice %7 {offsets = [24, 0], sizes = [8, 64], strides = [1, 1]} : vector<64x64xf32> to vector<8x64xf32>
    %cst_12 = arith.constant dense<0.000000e+00> : vector<8x64xf32>
    %71 = tpu.matmul %69, %2, %cst_12 {dimension_numbers = #tpu.dot_dimension_numbers<[1], [0], [0], [1], [0, 0, 1, 1], [], []>} : vector<8x16xf32>, vector<16x64xf32>, vector<8x64xf32> -> vector<8x64xf32>
    %72 = arith.addf %70, %71 : vector<8x64xf32>
    %73 = arith.mulf %72, %16 : vector<8x64xf32>
    %74 = math.tanh %73 : vector<8x64xf32>
    %75 = arith.mulf %16, %74 : vector<8x64xf32>
    %76 = arith.addf %19, %75 : vector<8x64xf32>
    %77 = vector.extract_strided_slice %76 {offsets = [0, 0], sizes = [8, 16], strides = [1, 1]} : vector<8x64xf32> to vector<8x16xf32>
    %78 = vector.extract_strided_slice %76 {offsets = [0, 16], sizes = [8, 16], strides = [1, 1]} : vector<8x64xf32> to vector<8x16xf32>
    %79 = vector.extract_strided_slice %76 {offsets = [0, 32], sizes = [8, 16], strides = [1, 1]} : vector<8x64xf32> to vector<8x16xf32>
    %80 = vector.extract_strided_slice %76 {offsets = [0, 48], sizes = [8, 16], strides = [1, 1]} : vector<8x64xf32> to vector<8x16xf32>
    %81 = arith.mulf %78, %67 : vector<8x16xf32>
    %82 = arith.mulf %77, %79 : vector<8x16xf32>
    %83 = arith.addf %81, %82 : vector<8x16xf32>
    %84 = math.tanh %83 : vector<8x16xf32>
    %85 = arith.mulf %80, %84 : vector<8x16xf32>
    %86 = vector.extract_strided_slice %7 {offsets = [32, 0], sizes = [8, 64], strides = [1, 1]} : vector<64x64xf32> to vector<8x64xf32>
    %cst_13 = arith.constant dense<0.000000e+00> : vector<8x64xf32>
    %87 = tpu.matmul %85, %2, %cst_13 {dimension_numbers = #tpu.dot_dimension_numbers<[1], [0], [0], [1], [0, 0, 1, 1], [], []>} : vector<8x16xf32>, vector<16x64xf32>, vector<8x64xf32> -> vector<8x64xf32>
    %88 = arith.addf %86, %87 : vector<8x64xf32>
    %89 = arith.mulf %88, %16 : vector<8x64xf32>
    %90 = math.tanh %89 : vector<8x64xf32>
    %91 = arith.mulf %16, %90 : vector<8x64xf32>
    %92 = arith.addf %19, %91 : vector<8x64xf32>
    %93 = vector.extract_strided_slice %92 {offsets = [0, 0], sizes = [8, 16], strides = [1, 1]} : vector<8x64xf32> to vector<8x16xf32>
    %94 = vector.extract_strided_slice %92 {offsets = [0, 16], sizes = [8, 16], strides = [1, 1]} : vector<8x64xf32> to vector<8x16xf32>
    %95 = vector.extract_strided_slice %92 {offsets = [0, 32], sizes = [8, 16], strides = [1, 1]} : vector<8x64xf32> to vector<8x16xf32>
    %96 = vector.extract_strided_slice %92 {offsets = [0, 48], sizes = [8, 16], strides = [1, 1]} : vector<8x64xf32> to vector<8x16xf32>
    %97 = arith.mulf %94, %83 : vector<8x16xf32>
    %98 = arith.mulf %93, %95 : vector<8x16xf32>
    %99 = arith.addf %97, %98 : vector<8x16xf32>
    %100 = math.tanh %99 : vector<8x16xf32>
    %101 = arith.mulf %96, %100 : vector<8x16xf32>
    %102 = vector.extract_strided_slice %7 {offsets = [40, 0], sizes = [8, 64], strides = [1, 1]} : vector<64x64xf32> to vector<8x64xf32>
    %cst_14 = arith.constant dense<0.000000e+00> : vector<8x64xf32>
    %103 = tpu.matmul %101, %2, %cst_14 {dimension_numbers = #tpu.dot_dimension_numbers<[1], [0], [0], [1], [0, 0, 1, 1], [], []>} : vector<8x16xf32>, vector<16x64xf32>, vector<8x64xf32> -> vector<8x64xf32>
    %104 = arith.addf %102, %103 : vector<8x64xf32>
    %105 = arith.mulf %104, %16 : vector<8x64xf32>
    %106 = math.tanh %105 : vector<8x64xf32>
    %107 = arith.mulf %16, %106 : vector<8x64xf32>
    %108 = arith.addf %19, %107 : vector<8x64xf32>
    %109 = vector.extract_strided_slice %108 {offsets = [0, 0], sizes = [8, 16], strides = [1, 1]} : vector<8x64xf32> to vector<8x16xf32>
    %110 = vector.extract_strided_slice %108 {offsets = [0, 16], sizes = [8, 16], strides = [1, 1]} : vector<8x64xf32> to vector<8x16xf32>
    %111 = vector.extract_strided_slice %108 {offsets = [0, 32], sizes = [8, 16], strides = [1, 1]} : vector<8x64xf32> to vector<8x16xf32>
    %112 = vector.extract_strided_slice %108 {offsets = [0, 48], sizes = [8, 16], strides = [1, 1]} : vector<8x64xf32> to vector<8x16xf32>
    %113 = arith.mulf %110, %99 : vector<8x16xf32>
    %114 = arith.mulf %109, %111 : vector<8x16xf32>
    %115 = arith.addf %113, %114 : vector<8x16xf32>
    %116 = math.tanh %115 : vector<8x16xf32>
    %117 = arith.mulf %112, %116 : vector<8x16xf32>
    %118 = vector.extract_strided_slice %7 {offsets = [48, 0], sizes = [8, 64], strides = [1, 1]} : vector<64x64xf32> to vector<8x64xf32>
    %cst_15 = arith.constant dense<0.000000e+00> : vector<8x64xf32>
    %119 = tpu.matmul %117, %2, %cst_15 {dimension_numbers = #tpu.dot_dimension_numbers<[1], [0], [0], [1], [0, 0, 1, 1], [], []>} : vector<8x16xf32>, vector<16x64xf32>, vector<8x64xf32> -> vector<8x64xf32>
    %120 = arith.addf %118, %119 : vector<8x64xf32>
    %121 = arith.mulf %120, %16 : vector<8x64xf32>
    %122 = math.tanh %121 : vector<8x64xf32>
    %123 = arith.mulf %16, %122 : vector<8x64xf32>
    %124 = arith.addf %19, %123 : vector<8x64xf32>
    %125 = vector.extract_strided_slice %124 {offsets = [0, 0], sizes = [8, 16], strides = [1, 1]} : vector<8x64xf32> to vector<8x16xf32>
    %126 = vector.extract_strided_slice %124 {offsets = [0, 16], sizes = [8, 16], strides = [1, 1]} : vector<8x64xf32> to vector<8x16xf32>
    %127 = vector.extract_strided_slice %124 {offsets = [0, 32], sizes = [8, 16], strides = [1, 1]} : vector<8x64xf32> to vector<8x16xf32>
    %128 = vector.extract_strided_slice %124 {offsets = [0, 48], sizes = [8, 16], strides = [1, 1]} : vector<8x64xf32> to vector<8x16xf32>
    %129 = arith.mulf %126, %115 : vector<8x16xf32>
    %130 = arith.mulf %125, %127 : vector<8x16xf32>
    %131 = arith.addf %129, %130 : vector<8x16xf32>
    %132 = math.tanh %131 : vector<8x16xf32>
    %133 = arith.mulf %128, %132 : vector<8x16xf32>
    %134 = vector.extract_strided_slice %7 {offsets = [56, 0], sizes = [8, 64], strides = [1, 1]} : vector<64x64xf32> to vector<8x64xf32>
    %cst_16 = arith.constant dense<0.000000e+00> : vector<8x64xf32>
    %135 = tpu.matmul %133, %2, %cst_16 {dimension_numbers = #tpu.dot_dimension_numbers<[1], [0], [0], [1], [0, 0, 1, 1], [], []>} : vector<8x16xf32>, vector<16x64xf32>, vector<8x64xf32> -> vector<8x64xf32>
    %136 = arith.addf %134, %135 : vector<8x64xf32>
    %137 = arith.mulf %136, %16 : vector<8x64xf32>
    %138 = math.tanh %137 : vector<8x64xf32>
    %139 = arith.mulf %16, %138 : vector<8x64xf32>
    %140 = arith.addf %19, %139 : vector<8x64xf32>
    %141 = vector.extract_strided_slice %140 {offsets = [0, 0], sizes = [8, 16], strides = [1, 1]} : vector<8x64xf32> to vector<8x16xf32>
    %142 = vector.extract_strided_slice %140 {offsets = [0, 16], sizes = [8, 16], strides = [1, 1]} : vector<8x64xf32> to vector<8x16xf32>
    %143 = vector.extract_strided_slice %140 {offsets = [0, 32], sizes = [8, 16], strides = [1, 1]} : vector<8x64xf32> to vector<8x16xf32>
    %144 = vector.extract_strided_slice %140 {offsets = [0, 48], sizes = [8, 16], strides = [1, 1]} : vector<8x64xf32> to vector<8x16xf32>
    %145 = arith.mulf %142, %131 : vector<8x16xf32>
    %146 = arith.mulf %141, %143 : vector<8x16xf32>
    %147 = arith.addf %145, %146 : vector<8x16xf32>
    %148 = math.tanh %147 : vector<8x16xf32>
    %149 = arith.mulf %144, %148 : vector<8x16xf32>
    %c0_17 = arith.constant 0 : index
    %c0_18 = arith.constant 0 : index
    %150 = vector.load %arg3[%c0_17, %c0_18] : memref<416x128xf32, #tpu.memory_space<vmem>>, vector<416x128xf32>
    %151 = vector.extract_strided_slice %150 {offsets = [0, 0], sizes = [16, 128], strides = [1, 1]} : vector<416x128xf32> to vector<16x128xf32>
    %152 = vector.extract_strided_slice %150 {offsets = [16, 0], sizes = [8, 128], strides = [1, 1]} : vector<416x128xf32> to vector<8x128xf32>
    %153 = vector.extract_strided_slice %150 {offsets = [24, 0], sizes = [128, 128], strides = [1, 1]} : vector<416x128xf32> to vector<128x128xf32>
    %154 = vector.extract_strided_slice %150 {offsets = [152, 0], sizes = [128, 128], strides = [1, 1]} : vector<416x128xf32> to vector<128x128xf32>
    %155 = vector.extract_strided_slice %150 {offsets = [280, 0], sizes = [128, 128], strides = [1, 1]} : vector<416x128xf32> to vector<128x128xf32>
    %156 = vector.extract_strided_slice %150 {offsets = [408, 0], sizes = [1, 128], strides = [1, 1]} : vector<416x128xf32> to vector<1x128xf32>
    %157 = vector.extract_strided_slice %150 {offsets = [409, 0], sizes = [1, 128], strides = [1, 1]} : vector<416x128xf32> to vector<1x128xf32>
    %158 = vector.extract_strided_slice %150 {offsets = [410, 0], sizes = [1, 128], strides = [1, 1]} : vector<416x128xf32> to vector<1x128xf32>
    %159 = vector.extract_strided_slice %150 {offsets = [411, 0], sizes = [1, 128], strides = [1, 1]} : vector<416x128xf32> to vector<1x128xf32>
    %c0_19 = arith.constant 0 : index
    %c0_20 = arith.constant 0 : index
    %160 = vector.load %arg1[%c0_19, %c0_20] : memref<8x8xf32, #tpu.memory_space<vmem>>, vector<8x8xf32>
    %cst_21 = arith.constant dense<0.000000e+00> : vector<8x128xf32>
    %161 = tpu.matmul %149, %151, %cst_21 {dimension_numbers = #tpu.dot_dimension_numbers<[1], [0], [0], [1], [0, 0, 1, 1], [], []>} : vector<8x16xf32>, vector<16x128xf32>, vector<8x128xf32> -> vector<8x128xf32>
    %cst_22 = arith.constant dense<0.000000e+00> : vector<8x128xf32>
    %162 = tpu.matmul %160, %152, %cst_22 {dimension_numbers = #tpu.dot_dimension_numbers<[1], [0], [0], [1], [0, 0, 1, 1], [], []>} : vector<8x8xf32>, vector<8x128xf32>, vector<8x128xf32> -> vector<8x128xf32>
    %163 = arith.addf %161, %162 : vector<8x128xf32>
    %164 = vector.broadcast %156 : vector<1x128xf32> to vector<8x128xf32>
    %165 = arith.addf %163, %164 : vector<8x128xf32>
    %cst_23 = arith.constant 0.000000e+00 : f32
    %166 = vector.broadcast %cst_23 : f32 to vector<8x128xf32>
    %167 = arith.maximumf %165, %166 : vector<8x128xf32>
    %cst_24 = arith.constant dense<0.000000e+00> : vector<8x128xf32>
    %168 = tpu.matmul %167, %153, %cst_24 {dimension_numbers = #tpu.dot_dimension_numbers<[1], [0], [0], [1], [0, 0, 1, 1], [], []>} : vector<8x128xf32>, vector<128x128xf32>, vector<8x128xf32> -> vector<8x128xf32>
    %169 = vector.broadcast %157 : vector<1x128xf32> to vector<8x128xf32>
    %170 = arith.addf %168, %169 : vector<8x128xf32>
    %cst_25 = arith.constant 0.000000e+00 : f32
    %171 = vector.broadcast %cst_25 : f32 to vector<8x128xf32>
    %172 = arith.maximumf %170, %171 : vector<8x128xf32>
    %cst_26 = arith.constant dense<0.000000e+00> : vector<8x128xf32>
    %173 = tpu.matmul %172, %154, %cst_26 {dimension_numbers = #tpu.dot_dimension_numbers<[1], [0], [0], [1], [0, 0, 1, 1], [], []>} : vector<8x128xf32>, vector<128x128xf32>, vector<8x128xf32> -> vector<8x128xf32>
    %174 = vector.broadcast %158 : vector<1x128xf32> to vector<8x128xf32>
    %175 = arith.addf %173, %174 : vector<8x128xf32>
    %cst_27 = arith.constant 0.000000e+00 : f32
    %176 = vector.broadcast %cst_27 : f32 to vector<8x128xf32>
    %177 = arith.maximumf %175, %176 : vector<8x128xf32>
    %cst_28 = arith.constant dense<0.000000e+00> : vector<8x128xf32>
    %178 = tpu.matmul %177, %155, %cst_28 {dimension_numbers = #tpu.dot_dimension_numbers<[1], [0], [0], [1], [0, 0, 1, 1], [], []>} : vector<8x128xf32>, vector<128x128xf32>, vector<8x128xf32> -> vector<8x128xf32>
    %179 = vector.broadcast %159 : vector<1x128xf32> to vector<8x128xf32>
    %180 = arith.addf %178, %179 : vector<8x128xf32>
    %c0_29 = arith.constant 0 : index
    %c0_30 = arith.constant 0 : index
    %181 = vector.load %arg4[%c0_29, %c0_30] : memref<8x128xf32, #tpu.memory_space<vmem>>, vector<8x128xf32>
    tpu.vector_store %arg4[%c0_29, %c0_30], %180 {strides = array<i32>} : memref<8x128xf32, #tpu.memory_space<vmem>>, vector<8x128xf32>,
    return
  }
}

</mosaic_0001>

<bundles_post_ra>
// kernel: _qnetwork_forward_impl.1
= control target key start
LH: loop header
LB: loop body
LE: loop exit
PB: predicated region body
PF: predicated region fallthrough
CT: control target
= control target key end

     0   :  { %9 = vsyncpa [#allocation3], 0  ;;  %s1855_s15 = smov [#allocation2]   ;;  %s2127_s0 = inlined_call_operand.vmem [shape: f32[64,8], index: 0, kind: input, shape index: {}]   ;;  %s2128_s1 = inlined_call_operand.vmem [shape: f32[8,8], index: 1, kind: input, shape index: {}]   ;;  %s2129_s2 = inlined_call_operand.vmem [shape: f32[32,64], index: 2, kind: input, shape index: {}]   ;;  %s2130_s3 = inlined_call_operand.hbm [shape: f32[416,128], index: 3, kind: input, shape index: {}]   ;;  %s2131_s4 = inlined_call_operand.vmem [shape: f32[8,128], index: 4, kind: output, shape index: {}]  }
   0x1   :  { %s21_s16 = sshll.u32 %s1855_s15, 4  ;;  %s1831_s19 = scalar_lea.hbm %s2130_s3, 6656  ;;  %s22_s16 = int_to_ptr.vmem [resolvable:$true] %s21_s16 }
   0x2   :  { %p1832_p0 = scmp.ne.s32.totalorder %s2130_s3, %s1831_s19  ;;  %p1835_p1 = scmp.lt.u32.totalorder %s1831_s19, %s2130_s3 }
   0x4   :  { %p1837_p2 = pnand %p1835_p1, %p1832_p0 }
   0x6   :  { %1840 = shalt.err (!%p1837_p2)
}
   0x7   :  { %s1841_s24 = scalar_lea.vmem %s22_s16, 6656  ;;  %p1846_p4 = scmp.lt.s32.totalorder %s22_s16, %s22_s16 }
   0x8   :  { %p1842_p3 = scmp.ne.s32.totalorder %s22_s16, %s1841_s24  ;;  %p1847_p5 = scmp.lt.s32.totalorder %s1841_s24, %s1841_s24 }
   0xa   :  { %p1848_p6 = por %p1847_p5, %p1846_p4 }
   0xc   :  { %p1849_p7 = pnand %p1848_p6, %p1842_p3 }
   0xe   :  { %1852 = shalt.err (!%p1849_p7)
}
   0xf   :  { %s1856_s25 = smov 128   ;;  %s1857_s26 = smov 8  }
  0x10   :  { %27 = dma.hbm_to_vmem [thread:$0]  %s2130_s3, 6656, %s22_s16, [#allocation3], %s1856_s25, %s1856_s25, %s1857_s26  }
  0x11   :  { %1853 = dma.done.wait [#allocation3], 6656  }
  0x12   :  { %1854 = vsyncadd [#allocation3], 4294960640  ;;  %v1858_v0 = vmov 0.0|0.0   ;;  %vm1859_vm0 = vmmov 0   ;;  %v1860_v1 = vmov 0.0   ;;  %vm47_vm1 = vcmask 64512  }
  0x13   :  { %1701 = vmatprep.subr.bf16.mxu0 %v1858_v0  ;;  %1548 = vmatprep.mubr.msk.f32.mxu0 %vm1859_vm0, %v1860_v1  ;;  %v31_v2 = vld [vmem:[%s2129_s2] sm:$0xff]  ;;  %v36_v4 = vld [vmem:[%s2127_s0 + $0x8] sm:$0xff]  ;;  %v33_v6 = vld [vmem:[%s2129_s2 + $0x10] sm:$0xff]  ;;  %v43_v14 = vlaneseq  ;;  %v1861_v36 = vmov 0.5   ;;  %s1863_s25 = smov 16   ;;  %s1864_s26 = smov 32  }
  0x14   :  { %v35_v3 = vld [vmem:[%s2127_s0] sm:$0xff]  ;;  %1502 = vmatprep.subr.mxu1 %v31_v2  ;;  %v32_v5 = vld [vmem:[%s2129_s2 + $0x8] sm:$0xff]  ;;  %v37_v7 = vld [vmem:[%s2127_s0 + $0x10] sm:$0xff]  ;;  %s1865_s27 = smov 80   ;;  %vm184_vm5 = vcmask 130048  }
  0x15   :  { %1504 = vmatprep.mubr.msk.f32.mxu1 %vm47_vm1, %v35_v3  ;;  %1503 = vmatpush3.msra.mxu1 %v31_v2  ;;  %v1925_v8 = vpack.c.bf16 %v33_v6, %v32_v5  ;;  %v38_v9 = vld [vmem:[%s2127_s0 + $0x18] sm:$0xff]  ;;  %v39_v10 = vld [vmem:[%s2127_s0 + $0x20] sm:$0xff]  ;;  %v40_v11 = vld [vmem:[%s2127_s0 + $0x28] sm:$0xff]  ;;  %v1961_v15 = vshrl.u32 %v43_v14, 7  ;;  %v178_v26 = vand.u32 127, %v43_v14 }
  0x16   :  { %1505 = vmatmul.mubr.msk.f32.vlgmr.msra.gmra.mrb[0].mxu1 %vm47_vm1, %v36_v4  ;;  %1689 = vmatprep.subr.bf16.mxu1 %v1858_v0  ;;  %v41_v12 = vld [vmem:[%s2127_s0 + $0x30] sm:$0xff]  ;;  %v42_v13 = vld [vmem:[%s2127_s0 + $0x38] sm:$0xff] }
  0x17   :  { %1691 = vmatpush3.bf16.msra.mxu1 %v1925_v8  ;;  %1507 = vmatprep.mubr.msk.f32.mxu1 %vm47_vm1, %v37_v7  ;;  %v45_v16 = vsub.s32 0, %v1961_v15  ;;  %v34_v17 = vld [vmem:[%s2129_s2 + $0x18] sm:$0xff]  ;;  %vm179_vm2 = vcmp.ge.s32.totalorder %v178_v26, 32  ;;  %vm180_vm3 = vcmp.lt.s32.totalorder %v178_v26, 48  ;;  %s1862_s2 = smov 96  }
  0x18   :  { %1692 = vmatprep.subr.bf16.mxu1 %v1858_v0  ;;  %1703 = vmatpush3.bf16.msra.mxu0 %v1925_v8  ;;  %vm181_vm4 = vmand %vm179_vm2, %vm180_vm3 }
  0x19   :  { %1707 = vmatprep.subr.bf16.mxu0 %v1858_v0  ;;  %v46_v18 = vrot.slane %v34_v17, %v45_v16  ;;  %v1981_v37 = vsel %vm181_vm4, 1.0, %v1861_v36  ;;  %v1984_v43 = vsel %vm181_vm4, 0.0, %v1861_v36 }
  0x1a   :  { %1508 = vmatmul.mubr.msk.f32.gmra.mrb[2].mxu1 %vm47_vm1, %v38_v9 }
  0x1b   :  { %1510 = vmatprep.mubr.msk.f32.mxu1 %vm47_vm1, %v39_v10 }
  0x1e   :  { %1511 = vmatmul.mubr.msk.f32.gmra.mrb[4].mxu1 %vm47_vm1, %v40_v11 }
  0x1f   :  { %1513 = vmatprep.mubr.msk.f32.mxu1 %vm47_vm1, %v41_v12 }
  0x22   :  { %1514 = vmatmul.mubr.msk.f32.gmra.mrb[6].mxu1 %vm47_vm1, %v42_v13 }
  0x23   :  { %1520 = vmatprep.mubr.msk.f32.mxu1 %vm1859_vm0, %v1860_v1 }
  0x26   :  { %1521 = vmatmul.mubr.f32.vlgmr.msra.gmra.mrb[8].mxu1 %v1860_v1 }
  0x27   :  { %1694 = vmatpush3.bf16.msra.mxu1 %v1925_v8  ;;  %1527 = vmatprep.mubr.msk.f32.mxu1 %vm1859_vm0, %v1860_v1 }
  0x28   :  { %1695 = vmatprep.subr.bf16.mxu1 %v1858_v0 }
  0xe9   :  { %v1506_v19 = vpop.f32.mrb[0].mxu1 }
  0xea   :  { %v144_v20 = vadd.f32 %v1506_v19, %v46_v18  ;;  %v138_v21 = vpop.f32.mrb[1].mxu1 }
  0xeb   :  { %v139_v35 = vadd.f32 %v138_v21, %v46_v18 }
  0xed   :  { %v1509_v22 = vpop.f32.mrb[2].mxu1 }
  0xee   :  { %v1969_v23 = vadd.f32 %v1509_v22, %v46_v18  ;;  %v148_v24 = vpop.f32.mrb[3].mxu1 }
  0xef   :  { %v1971_v25 = vadd.f32 %v148_v24, %v46_v18 }
  0xf1   :  { %v1512_v27 = vpop.f32.mrb[4].mxu1 }
  0xf2   :  { %v1973_v28 = vadd.f32 %v1512_v27, %v46_v18  ;;  %v158_v29 = vpop.f32.mrb[5].mxu1 }
  0xf3   :  { %v1975_v30 = vadd.f32 %v158_v29, %v46_v18 }
  0xf5   :  { %v1515_v31 = vpop.f32.mrb[6].mxu1 }
  0xf6   :  { %v1977_v32 = vadd.f32 %v1515_v31, %v46_v18  ;;  %v168_v33 = vpop.f32.mrb[7].mxu1 }
  0xf7   :  { %v1979_v34 = vadd.f32 %v168_v33, %v46_v18 }
  0xf9   :  { %v254_v38 = vpop.f32.mrb[8].mxu1 }
  0xfa   :  { %v258_v39 = vadd.f32 %v254_v38, %v139_v35  ;;  %v1522_v40 = vpop.f32.mrb[9].mxu1 }
  0xfc   :  { %v259_v41 = vmul.f32 %v258_v39, %v1981_v37 }
  0xfe   :  { %1799 = vtanh.f32 %v259_v41 }
 0x108   :  { %v1800_v42 = vpop.eup %1799 }
 0x109   :  { %v261_v44 = vmul.f32 %v1800_v42, %v1981_v37 }
 0x10b   :  { %v262_v45 = vadd.f32 %v261_v44, %v1984_v43 }
 0x10d   :  { %265 = vrot.lane.b32.xlu0 %v262_v45, %s1862_s2  ;;  %v263_v48 = vmul.f32 0.0, %v262_v45 }
 0x17f   :  { %v266_v46 = vpop.permute.xlu0 %265 }
 0x180   :  { %v268_v47 = vmul.f32 %v266_v46, %v262_v45 }
 0x182   :  { %270 = vrot.lane.b32.xlu0 %v268_v47, %s1863_s25 }
 0x1f4   :  { %v271_v49 = vpop.permute.xlu0 %270 }
 0x1f5   :  { %v273_v50 = vadd.f32 %v271_v49, %v263_v48 }
 0x1f7   :  { %1801 = vtanh.f32 %v273_v50 }
 0x201   :  { %v1802_v51 = vpop.eup %1801 }
 0x202   :  { %276 = vrot.lane.b32.xlu1 %v1802_v51, %s1864_s26 }
 0x274   :  { %v277_v52 = vpop.permute.xlu1 %276 }
 0x275   :  { %v279_v53 = vmul.f32 %v277_v52, %v262_v45 }
 0x277   :  { %281 = vrot.lane.b32.xlu1 %v279_v53, %s1865_s27 }
 0x2e9   :  { %v282_v54 = vpop.permute.xlu1 %281 }
 0x2ea   :  { %1528 = vmatmul.mubr.msk.f32.vlgmr.msra.gmra.mrb[10].mxu1 %vm184_vm5, %v282_v54 }
 0x2eb   :  { %1697 = vmatpush3.bf16.msra.mxu1 %v1925_v8  ;;  %1534 = vmatprep.mubr.msk.f32.mxu1 %vm1859_vm0, %v1860_v1 }
 0x2ec   :  { %1698 = vmatprep.subr.bf16.mxu1 %v1858_v0 }
 0x3bd   :  { %v351_v55 = vpop.f32.mrb[10].mxu1 }
 0x3be   :  { %v355_v56 = vadd.f32 %v351_v55, %v144_v20  ;;  %v1529_v57 = vpop.f32.mrb[11].mxu1 }
 0x3c0   :  { %v356_v58 = vmul.f32 %v355_v56, %v1981_v37 }
 0x3c2   :  { %1803 = vtanh.f32 %v356_v58 }
 0x3cc   :  { %v1804_v59 = vpop.eup %1803 }
 0x3cd   :  { %v358_v60 = vmul.f32 %v1804_v59, %v1981_v37 }
 0x3cf   :  { %v359_v61 = vadd.f32 %v358_v60, %v1984_v43 }
 0x3d1   :  { %362 = vrot.lane.b32.xlu0 %v359_v61, %s1862_s2  ;;  %v360_v2 = vmul.f32 %v359_v61, %v273_v50 }
 0x443   :  { %v363_v62 = vpop.permute.xlu0 %362 }
 0x444   :  { %v365_v63 = vmul.f32 %v363_v62, %v359_v61 }
 0x446   :  { %367 = vrot.lane.b32.xlu1 %v365_v63, %s1863_s25 }
 0x4b8   :  { %v368_v3 = vpop.permute.xlu1 %367 }
 0x4b9   :  { %v370_v4 = vadd.f32 %v368_v3, %v360_v2 }
 0x4bb   :  { %1805 = vtanh.f32 %v370_v4 }
 0x4c5   :  { %v1806_v5 = vpop.eup %1805 }
 0x4c6   :  { %373 = vrot.lane.b32.xlu0 %v1806_v5, %s1864_s26 }
 0x538   :  { %v374_v6 = vpop.permute.xlu0 %373 }
 0x539   :  { %v376_v7 = vmul.f32 %v374_v6, %v359_v61 }
 0x53b   :  { %378 = vrot.lane.b32.xlu1 %v376_v7, %s1865_s27 }
 0x5ad   :  { %v379_v9 = vpop.permute.xlu1 %378 }
 0x5ae   :  { %1535 = vmatmul.mubr.msk.f32.vlgmr.msra.gmra.mrb[12].mxu1 %vm184_vm5, %v379_v9 }
 0x5af   :  { %1700 = vmatpush3.bf16.msra.mxu1 %v1925_v8  ;;  %1541 = vmatprep.mubr.msk.f32.mxu1 %vm1859_vm0, %v1860_v1 }
 0x5b0   :  { %1704 = vmatprep.subr.bf16.mxu1 %v1858_v0 }
 0x681   :  { %v448_v10 = vpop.f32.mrb[12].mxu1 }
 0x682   :  { %v452_v11 = vadd.f32 %v448_v10, %v1971_v25  ;;  %v1536_v12 = vpop.f32.mrb[13].mxu1 }
 0x684   :  { %v453_v13 = vmul.f32 %v452_v11, %v1981_v37 }
 0x686   :  { %1807 = vtanh.f32 %v453_v13 }
 0x690   :  { %v1808_v14 = vpop.eup %1807 }
 0x691   :  { %v455_v17 = vmul.f32 %v1808_v14, %v1981_v37 }
 0x693   :  { %v456_v18 = vadd.f32 %v455_v17, %v1984_v43 }
 0x695   :  { %459 = vrot.lane.b32.xlu0 %v456_v18, %s1862_s2  ;;  %v457_v21 = vmul.f32 %v456_v18, %v370_v4 }
 0x707   :  { %v460_v19 = vpop.permute.xlu0 %459 }
 0x708   :  { %v462_v20 = vmul.f32 %v460_v19, %v456_v18 }
 0x70a   :  { %464 = vrot.lane.b32.xlu1 %v462_v20, %s1863_s25 }
 0x77c   :  { %v465_v22 = vpop.permute.xlu1 %464 }
 0x77d   :  { %v467_v24 = vadd.f32 %v465_v22, %v457_v21 }
 0x77f   :  { %1809 = vtanh.f32 %v467_v24 }
 0x789   :  { %v1810_v25 = vpop.eup %1809 }
 0x78a   :  { %470 = vrot.lane.b32.xlu0 %v1810_v25, %s1864_s26 }
 0x7fc   :  { %v471_v26 = vpop.permute.xlu0 %470 }
 0x7fd   :  { %v473_v27 = vmul.f32 %v471_v26, %v456_v18 }
 0x7ff   :  { %475 = vrot.lane.b32.xlu1 %v473_v27, %s1865_s27 }
 0x871   :  { %v476_v29 = vpop.permute.xlu1 %475 }
 0x872   :  { %1542 = vmatmul.mubr.msk.f32.vlgmr.msra.gmra.mrb[14].mxu1 %vm184_vm5, %v476_v29 }
 0x873   :  { %1706 = vmatpush3.bf16.msra.mxu1 %v1925_v8  ;;  %1555 = vmatprep.mubr.msk.f32.mxu1 %vm1859_vm0, %v1860_v1 }
 0x874   :  { %1710 = vmatprep.subr.bf16.mxu1 %v1858_v0 }
 0x945   :  { %v545_v31 = vpop.f32.mrb[14].mxu1 }
 0x946   :  { %v549_v33 = vadd.f32 %v545_v31, %v1969_v23  ;;  %v1543_v35 = vpop.f32.mrb[15].mxu1 }
 0x948   :  { %v550_v36 = vmul.f32 %v549_v33, %v1981_v37 }
 0x94a   :  { %1811 = vtanh.f32 %v550_v36 }
 0x954   :  { %v1812_v38 = vpop.eup %1811 }
 0x955   :  { %v552_v39 = vmul.f32 %v1812_v38, %v1981_v37 }
 0x957   :  { %v553_v40 = vadd.f32 %v552_v39, %v1984_v43 }
 0x959   :  { %556 = vrot.lane.b32.xlu0 %v553_v40, %s1862_s2  ;;  %v554_v44 = vmul.f32 %v553_v40, %v467_v24 }
 0x9cb   :  { %v557_v41 = vpop.permute.xlu0 %556 }
 0x9cc   :  { %v559_v42 = vmul.f32 %v557_v41, %v553_v40 }
 0x9ce   :  { %561 = vrot.lane.b32.xlu1 %v559_v42, %s1863_s25 }
 0xa40   :  { %v562_v45 = vpop.permute.xlu1 %561 }
 0xa41   :  { %v564_v46 = vadd.f32 %v562_v45, %v554_v44 }
 0xa43   :  { %1813 = vtanh.f32 %v564_v46 }
 0xa4d   :  { %v1814_v23 = vpop.eup %1813 }
 0xa4e   :  { %567 = vrot.lane.b32.xlu0 %v1814_v23, %s1864_s26 }
 0xac0   :  { %v568_v47 = vpop.permute.xlu0 %567 }
 0xac1   :  { %v570_v48 = vmul.f32 %v568_v47, %v553_v40 }
 0xac3   :  { %572 = vrot.lane.b32.xlu1 %v570_v48, %s1865_s27 }
 0xb35   :  { %v573_v49 = vpop.permute.xlu1 %572 }
 0xb36   :  { %1549 = vmatmul.mubr.msk.f32.vlgmr.msra.gmra.mrb[0].mxu0 %vm184_vm5, %v573_v49 }
 0xb37   :  { %1709 = vmatpush3.bf16.msra.mxu0 %v1925_v8  ;;  %1562 = vmatprep.mubr.msk.f32.mxu0 %vm1859_vm0, %v1860_v1 }
 0xb38   :  { %1572 = vmatprep.subr.mxu0 %v1860_v1 }
 0xc09   :  { %v642_v50 = vpop.f32.mrb[0].mxu0 }
 0xc0a   :  { %v646_v51 = vadd.f32 %v642_v50, %v1975_v30  ;;  %v1550_v52 = vpop.f32.mrb[1].mxu0 }
 0xc0c   :  { %v647_v53 = vmul.f32 %v646_v51, %v1981_v37 }
 0xc0e   :  { %1815 = vtanh.f32 %v647_v53  ;;  %v959_v53 = vld [vmem:[#allocation2] sm:$0xff] }
 0xc18   :  { %v1816_v54 = vpop.eup %1815 }
 0xc19   :  { %v649_v55 = vmul.f32 %v1816_v54, %v1981_v37  ;;  %v960_v54 = vld [vmem:[#allocation2 + $0x8] sm:$0xff] }
 0xc1b   :  { %v650_v56 = vadd.f32 %v649_v55, %v1984_v43  ;;  %v1714_v55 = vpack.c.bf16 %v960_v54, %v959_v53 }
 0xc1d   :  { %653 = vrot.lane.b32.xlu0 %v650_v56, %s1862_s2  ;;  %v651_v59 = vmul.f32 %v650_v56, %v564_v46 }
 0xc8f   :  { %v654_v57 = vpop.permute.xlu0 %653 }
 0xc90   :  { %v656_v58 = vmul.f32 %v654_v57, %v650_v56  ;;  %v963_v57 = vld [vmem:[#allocation2 + $0x20] sm:$0xff] }
 0xc92   :  { %658 = vrot.lane.b32.xlu1 %v656_v58, %s1863_s25  ;;  %v964_v58 = vld [vmem:[#allocation2 + $0x28] sm:$0xff] }
 0xd04   :  { %v659_v60 = vpop.permute.xlu1 %658 }
 0xd05   :  { %v661_v61 = vadd.f32 %v659_v60, %v651_v59  ;;  %v965_v60 = vld [vmem:[#allocation2 + $0x30] sm:$0xff] }
 0xd07   :  { %1817 = vtanh.f32 %v661_v61 }
 0xd11   :  { %v1818_v30 = vpop.eup %1817 }
 0xd12   :  { %664 = vrot.lane.b32.xlu0 %v1818_v30, %s1864_s26  ;;  %v966_v30 = vld [vmem:[#allocation2 + $0x38] sm:$0xff] }
 0xd84   :  { %v665_v62 = vpop.permute.xlu0 %664 }
 0xd85   :  { %v667_v63 = vmul.f32 %v665_v62, %v650_v56  ;;  %v962_v56 = vld [vmem:[#allocation2 + $0x18] sm:$0xff]  ;;  %v967_v62 = vld [vmem:[#allocation2 + $0x40] sm:$0xff] }
 0xd86   :  { %v1717_v59 = vpack.c.bf16 %v963_v57, %v962_v56  ;;  %v994_v56 = vld [vmem:[#allocation2 + $0x118] sm:$0xff]  ;;  %v995_v57 = vld [vmem:[#allocation2 + $0x120] sm:$0xff] }
 0xd87   :  { %669 = vrot.lane.b32.xlu1 %v667_v63, %s1865_s27  ;;  %v1723_v63 = vpack.c.bf16 %v967_v62, %v966_v30  ;;  %v999_v30 = vld [vmem:[#allocation2 + $0x140] sm:$0xff] }
 0xdf9   :  { %v670_v2 = vpop.permute.xlu1 %669 }
 0xdfa   :  { %1556 = vmatmul.mubr.msk.f32.vlgmr.msra.gmra.mrb[16].mxu1 %vm184_vm5, %v670_v2  ;;  %v968_v2 = vld [vmem:[#allocation2 + $0x48] sm:$0xff] }
 0xdfb   :  { %1712 = vmatpush3.bf16.msra.mxu1 %v1925_v8  ;;  %1569 = vmatprep.mubr.msk.f32.mxu1 %vm1859_vm0, %v1860_v1 }
 0xdfc   :  { %1713 = vmatprep.subr.bf16.mxu1 %v1858_v0 }
 0xecd   :  { %v739_v3 = vpop.f32.mrb[16].mxu1 }
 0xece   :  { %v743_v4 = vadd.f32 %v739_v3, %v1973_v28  ;;  %v1557_v5 = vpop.f32.mrb[17].mxu1  ;;  %v969_v3 = vld [vmem:[#allocation2 + $0x50] sm:$0xff] }
 0xed0   :  { %v744_v6 = vmul.f32 %v743_v4, %v1981_v37 }
 0xed2   :  { %1819 = vtanh.f32 %v744_v6  ;;  %v1726_v6 = vpack.c.bf16 %v969_v3, %v968_v2  ;;  %v1002_v3 = vld [vmem:[#allocation2 + $0x158] sm:$0xff] }
 0xedc   :  { %v1820_v7 = vpop.eup %1819 }
 0xedd   :  { %v746_v9 = vmul.f32 %v1820_v7, %v1981_v37  ;;  %v970_v7 = vld [vmem:[#allocation2 + $0x58] sm:$0xff] }
 0xedf   :  { %v747_v10 = vadd.f32 %v746_v9, %v1984_v43  ;;  %v971_v9 = vld [vmem:[#allocation2 + $0x60] sm:$0xff] }
 0xee1   :  { %750 = vrot.lane.b32.xlu0 %v747_v10, %s1862_s2  ;;  %v748_v12 = vmul.f32 %v747_v10, %v661_v61  ;;  %v1720_v61 = vpack.c.bf16 %v965_v60, %v964_v58  ;;  %v996_v58 = vld [vmem:[#allocation2 + $0x128] sm:$0xff]  ;;  %v997_v60 = vld [vmem:[#allocation2 + $0x130] sm:$0xff] }
 0xf53   :  { %v751_v8 = vpop.permute.xlu0 %750 }
 0xf54   :  { %v753_v11 = vmul.f32 %v751_v8, %v747_v10  ;;  %v972_v8 = vld [vmem:[#allocation2 + $0x68] sm:$0xff] }
 0xf56   :  { %755 = vrot.lane.b32.xlu1 %v753_v11, %s1863_s25  ;;  %v973_v11 = vld [vmem:[#allocation2 + $0x70] sm:$0xff] }
 0xfc8   :  { %v756_v13 = vpop.permute.xlu1 %755 }
 0xfc9   :  { %v758_v14 = vadd.f32 %v756_v13, %v748_v12  ;;  %v1732_v12 = vpack.c.bf16 %v973_v11, %v972_v8  ;;  %v1007_v8 = vld [vmem:[#allocation2 + $0x180] sm:$0xff] }
 0xfcb   :  { %1821 = vtanh.f32 %v758_v14 }
 0xfd5   :  { %v1822_v28 = vpop.eup %1821 }
 0xfd6   :  { %761 = vrot.lane.b32.xlu0 %v1822_v28, %s1864_s26  ;;  %v975_v28 = vld [vmem:[#allocation2 + $0x80] sm:$0xff] }
0x1048   :  { %v762_v17 = vpop.permute.xlu0 %761 }
0x1049   :  { %v764_v18 = vmul.f32 %v762_v17, %v747_v10  ;;  %v1729_v10 = vpack.c.bf16 %v971_v9, %v970_v7  ;;  %v1005_v7 = vld [vmem:[#allocation2 + $0x170] sm:$0xff] }
0x104b   :  { %766 = vrot.lane.b32.xlu1 %v764_v18, %s1865_s27 }
0x10bd   :  { %v767_v19 = vpop.permute.xlu1 %766 }
0x10be   :  { %1563 = vmatmul.mubr.msk.f32.vlgmr.msra.gmra.mrb[2].mxu0 %vm184_vm5, %v767_v19 }
0x10bf   :  { %1574 = vmatprep.mubr.msk.f32.mxu0 %vm1859_vm0, %v1860_v1 }
0x1191   :  { %v836_v20 = vpop.f32.mrb[2].mxu0 }
0x1192   :  { %v840_v21 = vadd.f32 %v836_v20, %v1979_v34  ;;  %v1564_v22 = vpop.f32.mrb[3].mxu0  ;;  %v976_v20 = vld [vmem:[#allocation2 + $0x88] sm:$0xff] }
0x1194   :  { %v841_v24 = vmul.f32 %v840_v21, %v1981_v37  ;;  %v977_v21 = vld [vmem:[#allocation2 + $0x90] sm:$0xff] }
0x1195   :  { %v1738_v22 = vpack.c.bf16 %v977_v21, %v976_v20  ;;  %v1009_v20 = vld [vmem:[#allocation2 + $0x190] sm:$0xff] }
0x1196   :  { %1823 = vtanh.f32 %v841_v24  ;;  %v978_v24 = vld [vmem:[#allocation2 + $0x98] sm:$0xff] }
0x11a0   :  { %v1824_v25 = vpop.eup %1823 }
0x11a1   :  { %v843_v26 = vmul.f32 %v1824_v25, %v1981_v37  ;;  %v979_v25 = vld [vmem:[#allocation2 + $0xa0] sm:$0xff] }
0x11a3   :  { %v844_v27 = vadd.f32 %v843_v26, %v1984_v43  ;;  %v980_v26 = vld [vmem:[#allocation2 + $0xa8] sm:$0xff] }
0x11a5   :  { %847 = vrot.lane.b32.xlu0 %v844_v27, %s1862_s2  ;;  %v845_v33 = vmul.f32 %v844_v27, %v758_v14  ;;  %v974_v14 = vld [vmem:[#allocation2 + $0x78] sm:$0xff] }
0x11a6   :  { %v1735_v17 = vpack.c.bf16 %v975_v28, %v974_v14 }
0x1217   :  { %v848_v29 = vpop.permute.xlu0 %847 }
0x1218   :  { %v850_v31 = vmul.f32 %v848_v29, %v844_v27  ;;  %v981_v29 = vld [vmem:[#allocation2 + $0xb0] sm:$0xff] }
0x121a   :  { %852 = vrot.lane.b32.xlu1 %v850_v31, %s1863_s25  ;;  %v1744_v31 = vpack.c.bf16 %v981_v29, %v980_v26  ;;  %v1318_v29 = vsub.s32 3, %v1961_v15 }
0x128c   :  { %v853_v35 = vpop.permute.xlu1 %852 }
0x128d   :  { %v855_v36 = vadd.f32 %v853_v35, %v845_v33  ;;  %v982_v33 = vld [vmem:[#allocation2 + $0xb8] sm:$0xff]  ;;  %v983_v35 = vld [vmem:[#allocation2 + $0xc0] sm:$0xff] }
0x128f   :  { %1825 = vtanh.f32 %v855_v36 }
0x1299   :  { %v1826_v34 = vpop.eup %1825 }
0x129a   :  { %858 = vrot.lane.b32.xlu0 %v1826_v34, %s1864_s26  ;;  %v984_v34 = vld [vmem:[#allocation2 + $0xc8] sm:$0xff] }
0x130c   :  { %v859_v38 = vpop.permute.xlu0 %858 }
0x130d   :  { %v861_v39 = vmul.f32 %v859_v38, %v844_v27  ;;  %v1741_v27 = vpack.c.bf16 %v979_v25, %v978_v24  ;;  %v985_v38 = vld [vmem:[#allocation2 + $0xd0] sm:$0xff] }
0x130f   :  { %863 = vrot.lane.b32.xlu1 %v861_v39, %s1865_s27  ;;  %v1750_v39 = vpack.c.bf16 %v985_v38, %v984_v34 }
0x1381   :  { %v864_v40 = vpop.permute.xlu1 %863 }
0x1382   :  { %1570 = vmatmul.mubr.msk.f32.vlgmr.msra.gmra.mrb[18].mxu1 %vm184_vm5, %v864_v40  ;;  %v986_v40 = vld [vmem:[#allocation2 + $0xd8] sm:$0xff] }
0x1383   :  { %1581 = vmatprep.mubr.msk.f32.mxu1 %vm1859_vm0, %v1860_v1  ;;  %1715 = vmatpush3.bf16.msra.mxu1 %v1714_v55  ;;  %v992_v55 = vld [vmem:[#allocation2 + $0x108] sm:$0xff] }
0x1384   :  { %1740 = vmatprep.subr.bf16.mxu1 %v1858_v0 }
0x1455   :  { %v933_v41 = vpop.f32.mrb[18].mxu1 }
0x1456   :  { %v937_v42 = vadd.f32 %v933_v41, %v1977_v32  ;;  %v1571_v44 = vpop.f32.mrb[19].mxu1  ;;  %v961_v32 = vld [vmem:[#allocation2 + $0x10] sm:$0xff]  ;;  %v987_v41 = vld [vmem:[#allocation2 + $0xe0] sm:$0xff] }
0x1457   :  { %1573 = vmatpush3.msra.mxu0 %v961_v32  ;;  %v988_v44 = vld [vmem:[#allocation2 + $0xe8] sm:$0xff] }
0x1458   :  { %v938_v45 = vmul.f32 %v937_v42, %v1981_v37  ;;  %1716 = vmatprep.subr.bf16.mxu0 %v1858_v0  ;;  %v1753_v42 = vpack.c.bf16 %v987_v41, %v986_v40 }
0x145a   :  { %1827 = vtanh.f32 %v938_v45  ;;  %v989_v45 = vld [vmem:[#allocation2 + $0xf0] sm:$0xff] }
0x1464   :  { %v1828_v46 = vpop.eup %1827 }
0x1465   :  { %v940_v23 = vmul.f32 %v1828_v46, %v1981_v37  ;;  %v1756_v46 = vpack.c.bf16 %v989_v45, %v988_v44 }
0x1467   :  { %v941_v47 = vadd.f32 %v940_v23, %v1984_v43  ;;  %v1011_v43 = vld [vmem:[%s2128_s1] sm:$0xff]  ;;  %v990_v23 = vld [vmem:[#allocation2 + $0xf8] sm:$0xff] }
0x1468   :  { %1575 = vmatmul.mubr.msk.f32.vlgmr.msra.gmra.mrb[4].mxu0 %vm47_vm1, %v1011_v43 }
0x1469   :  { %944 = vrot.lane.b32.xlu0 %v941_v47, %s1862_s2  ;;  %v942_v50 = vmul.f32 %v941_v47, %v855_v36  ;;  %1616 = vmatprep.mubr.msk.f32.mxu0 %vm1859_vm0, %v1860_v1  ;;  %v1747_v36 = vpack.c.bf16 %v983_v35, %v982_v33 }
0x146a   :  { %1718 = vmatpush3.bf16.msra.mxu0 %v1717_v59  ;;  %v1765_v59 = vpack.c.bf16 %v995_v57, %v994_v56 }
0x146b   :  { %1719 = vmatprep.subr.bf16.mxu0 %v1858_v0 }
0x146e   :  { %1721 = vmatpush3.bf16.msra.mxu0 %v1720_v61  ;;  %v998_v61 = vld [vmem:[#allocation2 + $0x138] sm:$0xff] }
0x146f   :  { %1722 = vmatprep.subr.bf16.mxu0 %v1858_v0  ;;  %v1771_v62 = vpack.c.bf16 %v999_v30, %v998_v61 }
0x1472   :  { %1724 = vmatpush3.bf16.msra.mxu0 %v1723_v63  ;;  %v1001_v63 = vld [vmem:[#allocation2 + $0x150] sm:$0xff] }
0x1473   :  { %1725 = vmatprep.subr.bf16.mxu0 %v1858_v0 }
0x1476   :  { %1727 = vmatpush3.bf16.msra.mxu0 %v1726_v6  ;;  %v1004_v6 = vld [vmem:[#allocation2 + $0x168] sm:$0xff] }
0x1477   :  { %1728 = vmatprep.subr.bf16.mxu0 %v1858_v0  ;;  %v1780_v9 = vpack.c.bf16 %v1005_v7, %v1004_v6 }
0x147a   :  { %1730 = vmatpush3.bf16.msra.mxu0 %v1729_v10  ;;  %v1006_v10 = vld [vmem:[#allocation2 + $0x178] sm:$0xff] }
0x147b   :  { %1731 = vmatprep.subr.bf16.mxu0 %v1858_v0  ;;  %v1783_v11 = vpack.c.bf16 %v1007_v8, %v1006_v10 }
0x147e   :  { %1733 = vmatpush3.bf16.msra.mxu0 %v1732_v12  ;;  %v1168_v12 = vsub.s32 1, %v1961_v15 }
0x147f   :  { %1734 = vmatprep.subr.bf16.mxu0 %v1858_v0 }
0x1482   :  { %1736 = vmatpush3.bf16.msra.mxu0 %v1735_v17 }
0x1483   :  { %1737 = vmatprep.subr.bf16.mxu0 %v1858_v0 }
0x1486   :  { %1739 = vmatpush3.bf16.msra.mxu0 %v1738_v22  ;;  %v1243_v22 = vsub.s32 2, %v1961_v15 }
0x1487   :  { %1764 = vmatprep.subr.bf16.mxu0 %v1858_v0 }
0x14db   :  { %v945_v48 = vpop.permute.xlu0 %944 }
0x14dc   :  { %v947_v49 = vmul.f32 %v945_v48, %v941_v47 }
0x14de   :  { %949 = vrot.lane.b32.xlu1 %v947_v49, %s1863_s25  ;;  %v2104_v49 = vld [vmem:[#allocation2 + $0x198] sm:$0xff] }
0x14df   :  { %v1244_v24 = vrot.slane %v2104_v49, %v1243_v22 }
0x153b   :  { %v1081_v18 = vpop.f32.mrb[4].mxu0 }
0x153c   :  { %v1576_v19 = vpop.f32.mrb[5].mxu0 }
0x153d   :  { %v1008_v19 = vld [vmem:[#allocation2 + $0x188] sm:$0xff] }
0x153e   :  { %v1786_v21 = vpack.c.bf16 %v1009_v20, %v1008_v19 }
0x1550   :  { %v950_v51 = vpop.permute.xlu1 %949 }
0x1551   :  { %v952_v52 = vadd.f32 %v950_v51, %v942_v50  ;;  %v1163_v50 = vrot.slane %v2104_v49, %v45_v16  ;;  %v1768_v16 = vpack.c.bf16 %v997_v60, %v996_v58 }
0x1553   :  { %1829 = vtanh.f32 %v952_v52 }
0x155d   :  { %v1830_v37 = vpop.eup %1829 }
0x155e   :  { %955 = vrot.lane.b32.xlu0 %v1830_v37, %s1864_s26  ;;  %v993_v37 = vld [vmem:[#allocation2 + $0x110] sm:$0xff] }
0x155f   :  { %v1762_v43 = vpack.c.bf16 %v993_v37, %v992_v55 }
0x15d0   :  { %v956_v4 = vpop.permute.xlu0 %955 }
0x15d1   :  { %v958_v5 = vmul.f32 %v956_v4, %v941_v47  ;;  %v991_v47 = vld [vmem:[#allocation2 + $0x100] sm:$0xff] }
0x15d2   :  { %v1759_v48 = vpack.c.bf16 %v991_v47, %v990_v23  ;;  %v1003_v4 = vld [vmem:[#allocation2 + $0x160] sm:$0xff] }
0x15d3   :  { %1086 = vrot.lane.b32.xlu1 %v958_v5, %s1865_s27  ;;  %v1777_v5 = vpack.c.bf16 %v1003_v4, %v1002_v3 }
0x1645   :  { %v1087_v13 = vpop.permute.xlu1 %1086 }
0x1646   :  { %1582 = vmatmul.mubr.msk.f32.vlgmr.msra.gmra.mrb[20].mxu1 %vm184_vm5, %v1087_v13  ;;  %v1169_v13 = vrot.slane %v2104_v49, %v1168_v12 }
0x1647   :  { %1651 = vmatprep.mubr.msk.f32.mxu1 %vm1859_vm0, %v1860_v1  ;;  %1742 = vmatpush3.bf16.msra.mxu1 %v1741_v27 }
0x1648   :  { %1743 = vmatprep.subr.bf16.mxu1 %v1858_v0 }
0x164b   :  { %1745 = vmatpush3.bf16.msra.mxu1 %v1744_v31  ;;  %v1319_v31 = vrot.slane %v2104_v49, %v1318_v29 }
0x164c   :  { %1746 = vmatprep.subr.bf16.mxu1 %v1858_v0 }
0x164f   :  { %1748 = vmatpush3.bf16.msra.mxu1 %v1747_v36 }
0x1650   :  { %1749 = vmatprep.subr.bf16.mxu1 %v1858_v0 }
0x1653   :  { %1751 = vmatpush3.bf16.msra.mxu1 %v1750_v39 }
0x1654   :  { %1752 = vmatprep.subr.bf16.mxu1 %v1858_v0 }
0x1657   :  { %1754 = vmatpush3.bf16.msra.mxu1 %v1753_v42 }
0x1658   :  { %1755 = vmatprep.subr.bf16.mxu1 %v1858_v0 }
0x165b   :  { %1757 = vmatpush3.bf16.msra.mxu1 %v1756_v46 }
0x165c   :  { %1758 = vmatprep.subr.bf16.mxu1 %v1858_v0 }
0x165f   :  { %1760 = vmatpush3.bf16.msra.mxu1 %v1759_v48 }
0x1660   :  { %1761 = vmatprep.subr.bf16.mxu1 %v1858_v0 }
0x1663   :  { %1763 = vmatpush3.bf16.msra.mxu1 %v1762_v43 }
0x1719   :  { %v1156_v51 = vpop.f32.mrb[20].mxu1 }
0x171a   :  { %v1157_v52 = vadd.f32 %v1156_v51, %v1081_v18  ;;  %v1583_v32 = vpop.f32.mrb[21].mxu1 }
0x171c   :  { %v1164_v53 = vadd.f32 %v1163_v50, %v1157_v52 }
0x171e   :  { %v1165_v54 = vmax.f32 %v1164_v53, 0.0 }
0x1720   :  { %1617 = vmatmul.mubr.f32.vlgmr.msra.gmra.mrb[6].mxu0 %v1165_v54 }
0x1721   :  { %1686 = vmatprep.mubr.msk.f32.mxu0 %vm1859_vm0, %v1860_v1  ;;  %1766 = vmatpush3.bf16.msra.mxu0 %v1765_v59  ;;  %v1000_v1 = vld [vmem:[#allocation2 + $0x148] sm:$0xff] }
0x1722   :  { %1767 = vmatprep.subr.bf16.mxu0 %v1858_v0  ;;  %v1774_v2 = vpack.c.bf16 %v1001_v63, %v1000_v1 }
0x1725   :  { %1769 = vmatpush3.bf16.msra.mxu0 %v1768_v16 }
0x1726   :  { %1770 = vmatprep.subr.bf16.mxu0 %v1858_v0 }
0x1729   :  { %1772 = vmatpush3.bf16.msra.mxu0 %v1771_v62 }
0x172a   :  { %1773 = vmatprep.subr.bf16.mxu0 %v1858_v0 }
0x172d   :  { %1775 = vmatpush3.bf16.msra.mxu0 %v1774_v2 }
0x172e   :  { %1776 = vmatprep.subr.bf16.mxu0 %v1858_v0 }
0x1731   :  { %1778 = vmatpush3.bf16.msra.mxu0 %v1777_v5 }
0x1732   :  { %1779 = vmatprep.subr.bf16.mxu0 %v1858_v0 }
0x1735   :  { %1781 = vmatpush3.bf16.msra.mxu0 %v1780_v9 }
0x1736   :  { %1782 = vmatprep.subr.bf16.mxu0 %v1858_v0 }
0x1739   :  { %1784 = vmatpush3.bf16.msra.mxu0 %v1783_v11 }
0x173a   :  { %1785 = vmatprep.subr.bf16.mxu0 %v1858_v0 }
0x173d   :  { %1787 = vmatpush3.bf16.msra.mxu0 %v1786_v21 }
0x17f3   :  { %v1236_v14 = vpop.f32.mrb[6].mxu0 }
0x17f4   :  { %v1237_v28 = vadd.f32 %v1236_v14, %v1169_v13  ;;  %v1618_v17 = vpop.f32.mrb[7].mxu0 }
0x17f6   :  { %v1240_v18 = vmax.f32 %v1237_v28, 0.0 }
0x17f8   :  { %1652 = vmatmul.mubr.f32.vlgmr.msra.gmra.mrb[22].mxu1 %v1240_v18 }
0x18cb   :  { %v1311_v25 = vpop.f32.mrb[22].mxu1 }
0x18cc   :  { %v1312_v26 = vadd.f32 %v1311_v25, %v1244_v24  ;;  %v1653_v0 = vpop.f32.mrb[23].mxu1 }
0x18ce   :  { %v1315_v27 = vmax.f32 %v1312_v26, 0.0 }
0x18d0   :  { %1687 = vmatmul.mubr.f32.vlgmr.msra.gmra.mrb[8].mxu0 %v1315_v27 }
0x19a3   :  { %v1386_v33 = vpop.f32.mrb[8].mxu0 }
0x19a4   :  { %v1387_v35 = vadd.f32 %v1386_v33, %v1319_v31  ;;  %v1688_v36 = vpop.f32.mrb[9].mxu0 }
0x19a6   :  { %1390 = vst [vmem:[%s2131_s4] sm:$0xff] %v1387_v35 }
0x19a7   :  { %1395 = vsyncpa [#allocation3], 1 }

</bundles_post_ra>
